<compile_context>
chip_gen: v6e
topology: v6e:2x2x1
jax: 0.10.0
libtpu: 0.0.40
codegen_flags: <defaults>
</compile_context>

<pallas_src>
import jax
import jax.numpy as jnp
from jax.experimental import pallas as pl
from jax.experimental.pallas import tpu as pltpu


# ---------------------------------------------------------------------------
# Pallas kernel: segmentation head (1x1 conv) fused with the meta broadcast
# add, NCHW kept.  Per grid step (b, t):
#     y = wT:(L, C) @ x:(C, hw_tile)      (MXU, f32 accumulate)
#     o = y + bm[b]:(L, 1)                (lane broadcast)
# The kernel is HBM-bound; the tiny MXU shape (L, C << 128) is harmless.
# ---------------------------------------------------------------------------
def seg_add_kernel(x_ref, wT_ref, bm_ref, o_ref):
    b = pl.program_id(0)
    y = jnp.dot(wT_ref[...], x_ref[0], preferred_element_type=jnp.float32)
    o_ref[0] = (y + bm_ref[b]).astype(o_ref.dtype)


# ---------------------------------------------------------------------------
# Tiling helpers (VMEM- and channel-aware, per perf review)
# ---------------------------------------------------------------------------
def _vmem_capacity_bytes():
    try:
        return int(pltpu.get_tpu_info().vmem_capacity_bytes)
    except Exception:
        return 64 * 1024 * 1024  # conservative fallback: v7x per-TC VMEM


def _choose_hw_tile(hw, c, l, itemsize, budget):
    """Largest multiple of 128 such that double-buffered (C + L) x tile blocks
    fit in `budget` bytes; never larger than H*W rounded down to 128."""
    if hw <= 128:
        return hw  # full-extent block (full-dim exemption to the 128 rule)
    per_lane = 2 * itemsize * (c + l)           # in + out, x2 buffers each
    tile = max(128, (budget // per_lane) // 128 * 128)
    tile = min(tile, max(128, (hw // 128) * 128))
    return tile


# ---------------------------------------------------------------------------
# Wrapper
# ---------------------------------------------------------------------------
@jax.jit
def meta_seg_forward(x_nchw, x_meta, params):
    B, C, H, W = x_nchw.shape
    HW = H * W
    L = params["seg_wT"].shape[0]

    # ---- meta branch: tiny MLP in plain jnp (few KB; no Pallas launch) ----
    # Fold BatchNorm1d (eval) + linear biases:
    #   (x @ w + b) * s + t == x @ (w * s) + (b * s + t)
    w1f = params["w1"] * params["bn1_scale"]
    shift1 = params["b1"] * params["bn1_scale"] + params["bn1_shift"]
    w2f = params["w2"] * params["bn2_scale"]
    shift2 = params["b2"] * params["bn2_scale"] + params["bn2_shift"]

    h = x_meta.astype(jnp.float32) @ w1f + shift1
    h = h * jax.nn.sigmoid(h)                     # Swish
    h = h @ w2f + shift2
    h = h * jax.nn.sigmoid(h)
    # Fold the seg-head bias into the meta logits so the seg kernel adds a
    # single per-batch vector.
    bm = h @ params["wfc"] + (params["bfc"] + params["seg_b"])   # (B, L) f32
    bm3 = bm[:, :, None]                                          # (B, L, 1)

    # ---- seg branch + broadcast add (Pallas), NCHW kept ----
    x3 = x_nchw.reshape(B, C, HW)                 # free reshape, NCHW order
    wT = params["seg_wT"].astype(x_nchw.dtype)    # (L, C), pre-transposed

    itemsize = jnp.dtype(x_nchw.dtype).itemsize
    cap = _vmem_capacity_bytes()
    budget = cap // 4                             # double-buffered working set
    hw_tile = _choose_hw_tile(HW, C, L, itemsize, budget)
    n_t = pl.cdiv(HW, hw_tile)
    if B * n_t < 2 and hw_tile > 128:
        # keep >=2 grid steps so v7x's two TensorCores both get work
        hw_tile = max(128, (hw_tile // 2) // 128 * 128)
        n_t = pl.cdiv(HW, hw_tile)

    working = 2 * itemsize * (C + L) * hw_tile
    vmem_limit = int(min(int(0.75 * cap), max(32 << 20, working + (4 << 20))))

    # TODO(synk): for very large C (>= ~1k) add a channel grid axis with an
    # f32 VMEM accumulator instead of shrinking hw_tile further.
    out = pl.pallas_call(
        seg_add_kernel,
        out_shape=jax.ShapeDtypeStruct((B, L, HW), x_nchw.dtype),
        grid=(B, n_t),
        in_specs=[
            pl.BlockSpec((1, C, hw_tile), lambda b, t: (b, 0, t)),
            pl.BlockSpec((L, C), lambda b, t: (0, 0)),
            # whole-array bm block: loaded once, indexed by program_id(0)
            pl.BlockSpec((B, L, 1), lambda b, t: (0, 0, 0)),
        ],
        out_specs=pl.BlockSpec((1, L, hw_tile), lambda b, t: (b, 0, t)),
        compiler_params=pltpu.CompilerParams(
            dimension_semantics=("parallel", "parallel"),
            vmem_limit_bytes=vmem_limit),
    )(x3, wT, bm3)

    # (B, L, H*W) -> (B, L, H, W): free reshape, already NCHW.
    return out.reshape(B, L, H, W)


def make_params(key, in_channels, n_labels, n_meta_features, n_meta_dim):
    d0, d1 = n_meta_dim
    ks = jax.random.split(key, 12)
    f32 = jnp.float32

    def lin(k, fan_in, fan_out):
        bound = 1.0 / jnp.sqrt(fan_in)
        kw, kb = jax.random.split(k)
        w = jax.random.uniform(kw, (fan_in, fan_out), f32, -bound, bound)
        b = jax.random.uniform(kb, (1, fan_out), f32, -bound, bound)
        return w, b

    w1, b1 = lin(ks[0], n_meta_features, d0)
    w2, b2 = lin(ks[1], d0, d1)
    wfc, bfc = lin(ks[2], d1, n_labels)
    # seg_model: 1x1 conv head; store the weight pre-transposed as (L, C_in)
    # so no per-call transpose is needed (perf review).
    seg_w, seg_b = lin(ks[3], in_channels, n_labels)
    seg_wT = seg_w.T                                   # (L, C)

    # BatchNorm1d (eval mode): fold gamma/beta/running stats into scale/shift.
    def bn_fold(kg, kb, km, kv, n, eps=1e-5):
        gamma = 1.0 + 0.1 * jax.random.normal(kg, (1, n), f32)
        beta = 0.1 * jax.random.normal(kb, (1, n), f32)
        rmean = 0.1 * jax.random.normal(km, (1, n), f32)
        rvar = 1.0 + 0.1 * jax.random.uniform(kv, (1, n), f32)
        scale = gamma / jnp.sqrt(rvar + eps)
        shift = beta - rmean * scale
        return scale, shift

    bn1_scale, bn1_shift = bn_fold(ks[4], ks[5], ks[6], ks[7], d0)
    bn2_scale, bn2_shift = bn_fold(ks[8], ks[9], ks[10], ks[11], d1)

    return dict(w1=w1, b1=b1, bn1_scale=bn1_scale, bn1_shift=bn1_shift,
                w2=w2, b2=b2, bn2_scale=bn2_scale, bn2_shift=bn2_shift,
                wfc=wfc, bfc=bfc, seg_wT=seg_wT, seg_b=seg_b)


# Pure-JAX reference for correctness checking (unfolded, PyTorch semantics).
def reference_forward(x_nchw, x_meta, params):
    swish = lambda v: v * jax.nn.sigmoid(v)
    h = x_meta @ params["w1"] + params["b1"]
    h = swish(h * params["bn1_scale"] + params["bn1_shift"])
    h = h @ params["w2"] + params["b2"]
    h = swish(h * params["bn2_scale"] + params["bn2_shift"])
    meta = h @ params["wfc"] + params["bfc"]              # (B, L)
    seg = jnp.einsum("bchw,lc->blhw", x_nchw, params["seg_wT"]) \
        + params["seg_b"][0][None, :, None, None]
    return seg + meta[:, :, None, None]


if __name__ == "__main__":
    B, C, H, W = 2, 4, 16, 16
    n_labels = 4
    n_meta_features = 8
    n_meta_dim = [32, 16]

    key = jax.random.PRNGKey(0)
    kx, km, kp = jax.random.split(key, 3)
    x = jax.random.normal(kx, (B, C, H, W), jnp.float32)
    x_meta = jax.random.normal(km, (B, n_meta_features), jnp.float32)
    params = make_params(kp, C, n_labels, n_meta_features, n_meta_dim)

    out = meta_seg_forward(x, x_meta, params)
    out = jax.block_until_ready(out)

    ref = reference_forward(x, x_meta, params)
    assert out.shape == (B, n_labels, H, W)
    assert jnp.allclose(out, ref, atol=1e-5, rtol=1e-5), "mismatch vs reference"

    # TODO(synk): seg_model is an injected nn.Module in the original code; it is
    # realised here as a 1x1-conv segmentation head rather than a full backbone.
    print("KERNEL_OK")
</pallas_src>

<mosaic_0001>
module attributes {stable_mosaic.version = 11 : i64} {
  func.func @seg_add_kernel(%arg0: i32, %arg1: i32, %arg2: memref<1x4x256xf32, #tpu.memory_space<vmem>>, %arg3: memref<4x4xf32, #tpu.memory_space<vmem>>, %arg4: memref<2x4x1xf32, #tpu.memory_space<vmem>>, %arg5: memref<1x4x256xf32, #tpu.memory_space<vmem>>) attributes {dimension_semantics = [#tpu.dimension_semantics<parallel>, #tpu.dimension_semantics<parallel>], iteration_bounds = array<i64: 2, 1>, scalar_prefetch = 0 : i64, scratch_operands = 0 : i64, tpu.core_type = #tpu.core_type<tc>, window_params = [{transform_indices = @transform_0, window_bounds = array<i64: 1, 4, 256>}, {pipeline_mode = #tpu.pipeline_mode<synchronous>, transform_indices = @transform_1, window_bounds = array<i64: 4, 4>}, {pipeline_mode = #tpu.pipeline_mode<synchronous>, transform_indices = @transform_2, window_bounds = array<i64: 2, 4, 1>}, {transform_indices = @transform_3, window_bounds = array<i64: 1, 4, 256>}]} {
    %c0 = arith.constant 0 : index
    %c0_0 = arith.constant 0 : index
    %0 = vector.load %arg3[%c0, %c0_0] : memref<4x4xf32, #tpu.memory_space<vmem>>, vector<4x4xf32>
    %c0_1 = arith.constant 0 : index
    %c0_2 = arith.constant 0 : index
    %c0_3 = arith.constant 0 : index
    %1 = vector.load %arg2[%c0_1, %c0_2, %c0_3] : memref<1x4x256xf32, #tpu.memory_space<vmem>>, vector<1x4x256xf32>
    %2 = vector.shape_cast %1 : vector<1x4x256xf32> to vector<4x256xf32>
    %cst = arith.constant dense<0.000000e+00> : vector<4x256xf32>
    %3 = tpu.matmul %0, %2, %cst {dimension_numbers = #tpu.dot_dimension_numbers<[1], [0], [0], [1], [0, 0, 1, 1], [], []>} : vector<4x4xf32>, vector<4x256xf32>, vector<4x256xf32> -> vector<4x256xf32>
    %4 = arith.index_cast %arg0 : i32 to index
    %c0_4 = arith.constant 0 : index
    %c0_5 = arith.constant 0 : index
    %5 = vector.load %arg4[%4, %c0_4, %c0_5] : memref<2x4x1xf32, #tpu.memory_space<vmem>>, vector<1x4x1xf32>
    %6 = vector.shape_cast %5 : vector<1x4x1xf32> to vector<4x1xf32>
    %7 = vector.broadcast %6 : vector<4x1xf32> to vector<4x256xf32>
    %8 = arith.addf %3, %7 : vector<4x256xf32>
    %c0_6 = arith.constant 0 : index
    %c0_7 = arith.constant 0 : index
    %c0_8 = arith.constant 0 : index
    %9 = vector.load %arg5[%c0_6, %c0_7, %c0_8] : memref<1x4x256xf32, #tpu.memory_space<vmem>>, vector<1x4x256xf32>
    %10 = vector.shape_cast %9 : vector<1x4x256xf32> to vector<4x256xf32>
    %11 = vector.shape_cast %8 : vector<4x256xf32> to vector<1x4x256xf32>
    tpu.vector_store %arg5[%c0_6, %c0_7, %c0_8], %11 {strides = array<i32>} : memref<1x4x256xf32, #tpu.memory_space<vmem>>, vector<1x4x256xf32>,
    return
  }
  func.func @transform_0(%arg0: i32, %arg1: i32) -> (i32, i32, i32) {
    %c0_i32 = arith.constant 0 : i32
    %c0_i32_0 = arith.constant 0 : i32
    return %arg0, %c0_i32, %arg1 : i32, i32, i32
  }
  func.func @transform_1(%arg0: i32, %arg1: i32) -> (i32, i32) {
    %c0_i32 = arith.constant 0 : i32
    %c0_i32_0 = arith.constant 0 : i32
    %c0_i32_1 = arith.constant 0 : i32
    return %c0_i32, %c0_i32_0 : i32, i32
  }
  func.func @transform_2(%arg0: i32, %arg1: i32) -> (i32, i32, i32) {
    %c0_i32 = arith.constant 0 : i32
    %c0_i32_0 = arith.constant 0 : i32
    %c0_i32_1 = arith.constant 0 : i32
    %c0_i32_2 = arith.constant 0 : i32
    return %c0_i32, %c0_i32_0, %c0_i32_1 : i32, i32, i32
  }
  func.func @transform_3(%arg0: i32, %arg1: i32) -> (i32, i32, i32) {
    %c0_i32 = arith.constant 0 : i32
    %c0_i32_0 = arith.constant 0 : i32
    return %arg0, %c0_i32, %arg1 : i32, i32, i32
  }
}

</mosaic_0001>

<bundles_post_ra>
// kernel: meta_seg_forward.1
= control target key start
LH: loop header
LB: loop body
LE: loop exit
PB: predicated region body
PF: predicated region fallthrough
CT: control target
= control target key end

     0   :  { %s487_s12 = smov 0   ;;  %s489_s13 = smov 0   ;;  %s526_s0 = inlined_call_operand.vmem [shape: f32[2,4,256], index: 0, kind: input, shape index: {}]   ;;  %s527_s1 = inlined_call_operand.vmem [shape: f32[4,4], index: 1, kind: input, shape index: {}]   ;;  %s528_s2 = inlined_call_operand.vmem [shape: f32[2,4,1], index: 2, kind: input, shape index: {}]   ;;  %s529_s3 = inlined_call_operand.vmem [shape: f32[2,4,256], index: 3, kind: output, shape index: {}]  }
   0x1   :  { %s491_s14 = smov 0  }
   0x2 LB: > { %s25_s15 = sadd.s32 1, %s459_s13  ;;  %p400_p0 = scmp.ge.s32.totalorder %s463_s14, 1  ;;  %s463_s14 = sphi %s491_s14, %s13_s14   ;;  %s459_s13 = sphi %s489_s13, %s531_s13   ;;  %s455_s12 = sphi %s487_s12, %s530_s12  }
   0x3   : > { %p27_p1 = scmp.ge.s32.totalorder %s25_s15, 2  ;;  %p158_p2 = scmp.lt.s32.totalorder %s463_s14, 3 }
   0x5   : > { %s533_s15 = smov (%p27_p1, %s25_s15), 0  ;;  %p159_p3 = pnand %p400_p0, %p158_p2 }
   0x6   : > { %p191_p4 = scmp.lt.s32.totalorder (!%p159_p3), %s455_s12, 1  ;;  %s405_s16 = sshll.u32 (!%p159_p3), %s455_s12, 2 }
   0x7   : > { %162 = sbr.rel (%p159_p3) target bundleno = 220 (0xdc), region = 32  ;;  %s213_s19 = scalar_lea.vmem (!%p159_p3), %s528_s2, %s405_s16 }
   0xc   : > { %v465_v0 = vmov 0.0   ;;  %s535_s12 = smov (!%p191_p4, %s455_s12), 1  ;;  %v466_v1 = vmov 0   ;;  %v214_v2 = vld [vmem:[%s213_s19] sm:$0xf]  ;;  %vm226_vm0 = vcmask 1043456  }
   0xd   : > { %295 = vmatprep.mubr.f32.mxu0 %v465_v0  ;;  %439 = vset.pattern.permute.xlu0 %v466_v1  ;;  %s411_s20 = sshll.u32 %s535_s12, 3  ;;  %v210_v5 = vld [vmem:[%s527_s1] sm:$0xf]  ;;  %vm222_vm1 = vcmask 31744  }
   0xe   : > { %s198_s23 = scalar_lea.vmem %s526_s0, %s411_s20  ;;  %217 = vperm.xlu0 %439, %v214_v2   ;;  %s208_s28 = scalar_lea.vmem %s529_s3, %s411_s20 }
   0xf   : > { %v211_v3 = vld [vmem:[%s198_s23] sm:$0xff] }
  0x10   : > { %v221_v4 = vcombine.high %v211_v3, %v211_v3 }
  0x12   : > { %406 = vmatprep.subr.msk.mxu0 %vm226_vm0, %v221_v4 }
  0x13   : > { %407 = vmatpush1.msk.msra.mxu0 %vm226_vm0, %v211_v3 }
  0x14   : > { %408 = vmatmul.mubr.msk.f32.vlgmr.msra.gmra.mxu0 %vm222_vm1, %v210_v5 }
  0x89   : > { %v218_v6 = vpop.permute.xlu0 %217 }
  0xd4   : > { %v297_v7 = vpop.f32.mrf.mxu0 }
  0xd5   : > { %v298_v9 = vadd.f32 %v297_v7, %v218_v6 }
  0xd6   : > { %v299_v8 = vpop.f32.mrf.mxu0 }
  0xd7   : > { %v300_v10 = vadd.f32 %v299_v8, %v218_v6 }
  0xd9   : > { %v304_v11 = vcombine.low %v298_v9, %v300_v10 }
  0xdb   : > { %306 = vst [vmem:[%s208_s28] sm:$0xff] %v304_v11 }
  0xdc PF: > { %s13_s14 = sadd.s32 1, %s463_s14   ;;  %s530_s12 = smov %s459_s13 }
  0xdd   : > { %p10_p5 = scmp.ge.s32.totalorder %s13_s14, 4   ;;  %s531_s13 = smov %s533_s15 }
  0xdf   :  { %12 = sbr.rel (!%p10_p5) target bundleno = 2 (0x2), region = 63 }

</bundles_post_ra>
